<compile_context>
chip_gen: v5e
topology: v5e:2x2
jax: 0.10.0
libtpu: 0.0.40
codegen_flags: <defaults>
</compile_context>

<pallas_src>
import functools

import jax
import jax.numpy as jnp
import numpy as np
from jax.experimental import pallas as pl
from jax.experimental.pallas import tpu as pltpu

NEG_SLOPE = 0.2
EPS = 1e-12  # F.normalize default eps
HIGHEST = jax.lax.Precision.HIGHEST


def _leaky(x):
    return jnp.where(x >= 0, x, NEG_SLOPE * x)


# --------------------------------------------------------------------------- #
# Pallas kernel: one (batch, query-tile) per grid step.  All [*, N]/[*, TN]
# arrays keep points on the lane axis (channels-first).
# --------------------------------------------------------------------------- #
def _pos_enc_kernel(pts_all_ref, pts_t_ref, pts_tile_ref,
                    w1d_ref, b1d_ref, w2d_ref, b2d_ref,
                    w1a_ref, b1a_ref, w2a_ref, b2a_ref,
                    out_ref, *, k, half_dim):
    pts_all = pts_all_ref[0]                                 # [3, N]   all points
    pts_t = pts_t_ref[0]                                     # [N, 3]   same, transposed
    pts_i = pts_tile_ref[0]                                  # [3, TN]  query tile
    n_all = pts_all.shape[1]
    tile_n = pts_i.shape[1]

    # ---- offsets from the global centroid (query tile only) --------------- #
    centroid = jnp.mean(pts_all, axis=1, keepdims=True)      # [3, 1]
    p2gc_i = pts_i - centroid                                # [3, TN]
    g_dis_i = jnp.sum(p2gc_i * p2gc_i, axis=0, keepdims=True)  # [1, TN]

    # ---- distance branch: Conv1d(1,64)+BN+LReLU, Conv1d(64,d/2)+BN+LReLU --- #
    # (BN scales pre-folded into w1d / w2d on the host.)
    h_dis = _leaky(w1d_ref[...] * g_dis_i + b1d_ref[...])    # [64, TN]
    dis_feat = _leaky(
        jnp.dot(w2d_ref[...], h_dis, preferred_element_type=jnp.float32)
        + b2d_ref[...])                                      # [half, TN]

    # ---- pairwise geometry via the Gram trick (MXU), no [N,N,3] tensor ----- #
    inv_gn = jax.lax.rsqrt(jnp.maximum(g_dis_i, EPS * EPS))  # == 1/max(||p2gc||,eps)
    p2gc_n_i = p2gc_i * inv_gn                               # [3, TN]

    # K=3 matmuls: HIGHEST is effectively free here and keeps kNN selection exact.
    gram = jnp.dot(pts_t, pts_i, precision=HIGHEST,
                   preferred_element_type=jnp.float32)       # [N, TN]  <pts_j, pts_i>
    proj = jnp.dot(pts_t, p2gc_n_i, precision=HIGHEST,
                   preferred_element_type=jnp.float32)       # [N, TN]  <pts_j, p2gc_n_i>

    xx_all = jnp.sum(pts_t * pts_t, axis=1, keepdims=True)   # [N, 1]
    xx_i = jnp.sum(pts_i * pts_i, axis=0, keepdims=True)     # [1, TN]
    cc_i = jnp.sum(p2gc_n_i * pts_i, axis=0, keepdims=True)  # [1, TN]

    dist2 = jnp.maximum(xx_all + xx_i - 2.0 * gram, 0.0)     # [N, TN] ||pts_j - pts_i||^2
    dot_raw = proj - cc_i                                    # [N, TN] <pts_j - pts_i, p2gc_n_i>

    # alpha[j,i] = cos(angle(pts_j - pts_i, p2gc_i)); exact 0 on the diagonal (self).
    i0 = pl.program_id(1) * tile_n
    row_j = jax.lax.broadcasted_iota(jnp.int32, (n_all, tile_n), 0)
    col_i = jax.lax.broadcasted_iota(jnp.int32, (n_all, tile_n), 1) + i0
    inv_ln = jax.lax.rsqrt(jnp.maximum(dist2, EPS * EPS))
    alpha = jnp.where(row_j == col_i, 0.0, dot_raw * inv_ln) # [N, TN]

    # ---- k nearest neighbours per query column (knock-out loop, no gather) -- #
    neg_inf = jnp.float32(-jnp.inf)
    work = -dist2
    for _ in range(k):                                       # k is small & static
        col_max = jnp.max(work, axis=0, keepdims=True)       # [1, TN]
        work = jnp.where(work == col_max, neg_inf, work)
    sel = work == neg_inf                                    # selected neighbour mask

    a_max = jnp.max(jnp.where(sel, alpha, neg_inf), axis=0, keepdims=True)          # [1, TN]
    a_min = jnp.min(jnp.where(sel, alpha, jnp.float32(jnp.inf)), axis=0, keepdims=True)

    # ---- angular branch: Conv2d(1,64)+BN+LReLU, max over k, Conv1d(64,d/2)+BN+LReLU
    # max_k leaky(alpha*g + b) = leaky((g>0 ? max alpha : min alpha)*g + b)
    g1 = w1a_ref[...]                                        # [64, 1] (BN folded)
    a_sel = jnp.where(g1 > 0, a_max, a_min)                  # [64, TN]
    h_ang = _leaky(a_sel * g1 + b1a_ref[...])                # [64, TN]
    ang_feat = _leaky(
        jnp.dot(w2a_ref[...], h_ang, preferred_element_type=jnp.float32)
        + b2a_ref[...])                                      # [half, TN]

    out_ref[0, :half_dim, :] = dis_feat                      # sublane slices (cheap)
    out_ref[0, half_dim:, :] = ang_feat


# --------------------------------------------------------------------------- #
# Wrapper
# --------------------------------------------------------------------------- #
def _fold_params(params):
    """Fold eval-mode BN scales into the conv weights; keep biases separate."""
    w1d = (params["w_dis1"] * params["s_dis1"][:, None]).astype(jnp.float32)   # [64, 1]
    b1d = params["b_dis1"][:, None].astype(jnp.float32)                        # [64, 1]
    w2d = (params["w_dis2"] * params["s_dis2"][:, None]).astype(jnp.float32)   # [half, 64]
    b2d = params["b_dis2"][:, None].astype(jnp.float32)                        # [half, 1]
    w1a = (params["w_ang1"] * params["s_ang1"][:, None]).astype(jnp.float32)   # [64, 1]
    b1a = params["b_ang1"][:, None].astype(jnp.float32)                        # [64, 1]
    w2a = (params["w_ang2"] * params["s_ang2"][:, None]).astype(jnp.float32)   # [half, 64]
    b2a = params["b_ang2"][:, None].astype(jnp.float32)                        # [half, 1]
    return [w1d, b1d, w2d, b2d, w1a, b1a, w2a, b2a]


def _pick_tile_n(n):
    """Lane-aligned query tile; budget ~6 live f32 [N, TN] planes to ~32 MiB."""
    candidates = [t for t in (512, 256, 128) if n > t and n % t == 0]
    if not candidates:
        return n                                             # small / odd N: whole row
    budget = 32 * 1024 * 1024
    for t in candidates:
        if 6 * n * t * 4 <= budget:
            return t
    return candidates[-1]


def position_encoding_pallas(points, params, k=5):
    """points: [B, 3, N] (PyTorch layout). Returns [B, dim, N]."""
    points = points.astype(jnp.float32)
    B, C, N = points.shape
    assert C == 3
    half = params["w_dis2"].shape[0]
    dim = 2 * half

    folded = _fold_params(params)
    # Tiny helper view of the raw points (3*N floats/batch) so the Gram matmuls
    # have an [N, 3] LHS without an in-kernel transpose.
    points_t = jnp.transpose(points, (0, 2, 1))              # [B, N, 3]

    tile_n = _pick_tile_n(N)
    n_tiles = N // tile_n

    in_specs = [
        pl.BlockSpec((1, 3, N), lambda b, t: (b, 0, 0)),         # all points (keys)
        pl.BlockSpec((1, N, 3), lambda b, t: (b, 0, 0)),         # all points, transposed
        pl.BlockSpec((1, 3, tile_n), lambda b, t: (b, 0, t)),    # query tile
    ]
    for w in folded:
        in_specs.append(pl.BlockSpec(w.shape, lambda b, t: (0, 0)))

    kern = functools.partial(_pos_enc_kernel, k=k, half_dim=half)
    out = pl.pallas_call(
        kern,
        out_shape=jax.ShapeDtypeStruct((B, dim, N), jnp.float32),
        grid=(B, n_tiles),
        in_specs=in_specs,
        out_specs=pl.BlockSpec((1, dim, tile_n), lambda b, t: (b, 0, t)),
        compiler_params=pltpu.CompilerParams(
            dimension_semantics=("parallel", "parallel"),
            vmem_limit_bytes=48 * 1024 * 1024,
        ),
    )(points, points_t, points, *folded)
    return out                                               # [B, dim, N]


# --------------------------------------------------------------------------- #
# Deterministic parameter init (mirrors the module's __init__ shapes, PyTorch
# orientation: conv weight [Cout, Cin], BN affine per channel).
# --------------------------------------------------------------------------- #
def init_params(key, dim):
    half = dim // 2
    keys = jax.random.split(key, 12)

    def conv_w(kk, cout, cin):
        return (0.2 * jax.random.normal(kk, (cout, cin))).astype(jnp.float32)

    def bn_affine(kg, kb, c):
        gamma = jax.random.uniform(kg, (c,), minval=0.5, maxval=1.5, dtype=jnp.float32)
        beta = (0.1 * jax.random.normal(kb, (c,))).astype(jnp.float32)
        running_mean = jnp.zeros((c,), jnp.float32)
        running_var = jnp.ones((c,), jnp.float32)
        scale = gamma * jax.lax.rsqrt(running_var + 1e-5)
        bias = beta - running_mean * scale
        return scale, bias

    p = {}
    p["w_dis1"] = conv_w(keys[0], 64, 1)
    p["s_dis1"], p["b_dis1"] = bn_affine(keys[1], keys[2], 64)
    p["w_dis2"] = conv_w(keys[3], half, 64)
    p["s_dis2"], p["b_dis2"] = bn_affine(keys[4], keys[5], half)
    p["w_ang1"] = conv_w(keys[6], 64, 1)
    p["s_ang1"], p["b_ang1"] = bn_affine(keys[7], keys[8], 64)
    p["w_ang2"] = conv_w(keys[9], half, 64)
    p["s_ang2"], p["b_ang2"] = bn_affine(keys[10], keys[11], half)
    return p


# --------------------------------------------------------------------------- #
# Pure-JAX reference (straight port of the PyTorch forward, eval-mode BN folded)
# --------------------------------------------------------------------------- #
def position_encoding_ref(points, params, k=5):
    x = points                                               # [B, 3, N]
    centroid = jnp.mean(x, axis=-1, keepdims=True)
    p2gc = x - centroid
    g_dis = jnp.sum(p2gc * p2gc, axis=1, keepdims=True)      # [B, 1, N]

    def conv_bn_lrelu(h, w, s, b):
        y = jnp.einsum("oc,bcn->bon", w, h, precision=HIGHEST)
        y = y * s[None, :, None] + b[None, :, None]
        return jnp.where(y >= 0, y, NEG_SLOPE * y)

    dis_feature = conv_bn_lrelu(
        conv_bn_lrelu(g_dis, params["w_dis1"], params["s_dis1"], params["b_dis1"]),
        params["w_dis2"], params["s_dis2"], params["b_dis2"])       # [B, d/2, N]

    # get_graph_feature(x, k)[:, :3] == x_j - x_i over kNN (self included)
    inner = -2.0 * jnp.einsum("bcn,bcm->bnm", x, x, precision=HIGHEST)
    xx = jnp.sum(x * x, axis=1, keepdims=True)               # [B, 1, N]
    pairwise = -xx - inner - jnp.transpose(xx, (0, 2, 1))    # [B, N, N]
    _, idx = jax.lax.top_k(pairwise, k)                      # [B, N, k]
    xt = jnp.transpose(x, (0, 2, 1))                         # [B, N, 3]
    neigh = jax.vmap(lambda p, i: p[i])(xt, idx)             # [B, N, k, 3]
    p2lc = neigh - xt[:, :, None, :]                         # [B, N, k, 3]

    def normalize(v):
        n = jnp.sqrt(jnp.sum(v * v, axis=-1, keepdims=True))
        return v / jnp.maximum(n, EPS)

    p2gc_t = jnp.transpose(p2gc, (0, 2, 1))                  # [B, N, 3]
    alpha = jnp.einsum("bnkd,bnd->bnk", normalize(p2lc), normalize(p2gc_t),
                       precision=HIGHEST)                    # [B, N, k]

    h1 = alpha[..., None] * params["w_ang1"][:, 0]           # [B, N, k, 64]
    h1 = h1 * params["s_ang1"] + params["b_ang1"]
    h1 = jnp.where(h1 >= 0, h1, NEG_SLOPE * h1)
    h1 = jnp.max(h1, axis=2)                                 # max over k  [B, N, 64]
    h2 = jnp.einsum("oc,bnc->bon", params["w_ang2"], h1, precision=HIGHEST)
    h2 = h2 * params["s_ang2"][None, :, None] + params["b_ang2"][None, :, None]
    ang_feature = jnp.where(h2 >= 0, h2, NEG_SLOPE * h2)     # [B, d/2, N]
    return jnp.concatenate([dis_feature, ang_feature], axis=1)    # [B, dim, N]


if __name__ == "__main__":
    key = jax.random.PRNGKey(0)
    k_params, k_pts = jax.random.split(key)

    B, N, dim, k = 2, 16, 32, 5
    points = jax.random.normal(k_pts, (B, 3, N), dtype=jnp.float32)   # PyTorch layout [B, 3, N]
    params = init_params(k_params, dim)

    out = jax.block_until_ready(position_encoding_pallas(points, params, k=k))
    assert out.shape == (B, dim, N)

    ref = position_encoding_ref(points, params, k=k)
    # Feature matmuls in the kernel use default MXU precision (bf16 inputs, f32
    # accumulation) per the perf review; the reference runs at f32 (HIGHEST).
    np.testing.assert_allclose(np.asarray(out), np.asarray(ref), rtol=2e-2, atol=2e-2)

    print("KERNEL_OK")
</pallas_src>

<mosaic_0001>
module attributes {stable_mosaic.version = 11 : i64} {
  func.func @_pos_enc_kernel(%arg0: i32, %arg1: i32, %arg2: memref<1x3x16xf32, #tpu.memory_space<vmem>>, %arg3: memref<1x16x3xf32, #tpu.memory_space<vmem>>, %arg4: memref<1x3x16xf32, #tpu.memory_space<vmem>>, %arg5: memref<64x1xf32, #tpu.memory_space<vmem>>, %arg6: memref<64x1xf32, #tpu.memory_space<vmem>>, %arg7: memref<16x64xf32, #tpu.memory_space<vmem>>, %arg8: memref<16x1xf32, #tpu.memory_space<vmem>>, %arg9: memref<64x1xf32, #tpu.memory_space<vmem>>, %arg10: memref<64x1xf32, #tpu.memory_space<vmem>>, %arg11: memref<16x64xf32, #tpu.memory_space<vmem>>, %arg12: memref<16x1xf32, #tpu.memory_space<vmem>>, %arg13: memref<1x32x16xf32, #tpu.memory_space<vmem>>) attributes {dimension_semantics = [#tpu.dimension_semantics<parallel>, #tpu.dimension_semantics<parallel>], iteration_bounds = array<i64: 2, 1>, scalar_prefetch = 0 : i64, scratch_operands = 0 : i64, tpu.core_type = #tpu.core_type<tc>, window_params = [{transform_indices = @transform_0, window_bounds = array<i64: 1, 3, 16>}, {transform_indices = @transform_1, window_bounds = array<i64: 1, 16, 3>}, {transform_indices = @transform_2, window_bounds = array<i64: 1, 3, 16>}, {pipeline_mode = #tpu.pipeline_mode<synchronous>, transform_indices = @transform_3, window_bounds = array<i64: 64, 1>}, {pipeline_mode = #tpu.pipeline_mode<synchronous>, transform_indices = @transform_4, window_bounds = array<i64: 64, 1>}, {pipeline_mode = #tpu.pipeline_mode<synchronous>, transform_indices = @transform_5, window_bounds = array<i64: 16, 64>}, {pipeline_mode = #tpu.pipeline_mode<synchronous>, transform_indices = @transform_6, window_bounds = array<i64: 16, 1>}, {pipeline_mode = #tpu.pipeline_mode<synchronous>, transform_indices = @transform_7, window_bounds = array<i64: 64, 1>}, {pipeline_mode = #tpu.pipeline_mode<synchronous>, transform_indices = @transform_8, window_bounds = array<i64: 64, 1>}, {pipeline_mode = #tpu.pipeline_mode<synchronous>, transform_indices = @transform_9, window_bounds = array<i64: 16, 64>}, {pipeline_mode = #tpu.pipeline_mode<synchronous>, transform_indices = @transform_10, window_bounds = array<i64: 16, 1>}, {transform_indices = @transform_11, window_bounds = array<i64: 1, 32, 16>}]} {
    %c0 = arith.constant 0 : index
    %c0_0 = arith.constant 0 : index
    %c0_1 = arith.constant 0 : index
    %0 = vector.load %arg2[%c0, %c0_0, %c0_1] : memref<1x3x16xf32, #tpu.memory_space<vmem>>, vector<1x3x16xf32>
    %1 = vector.shape_cast %0 : vector<1x3x16xf32> to vector<3x16xf32>
    %c0_2 = arith.constant 0 : index
    %c0_3 = arith.constant 0 : index
    %c0_4 = arith.constant 0 : index
    %2 = vector.load %arg3[%c0_2, %c0_3, %c0_4] : memref<1x16x3xf32, #tpu.memory_space<vmem>>, vector<1x16x3xf32>
    %3 = vector.shape_cast %2 : vector<1x16x3xf32> to vector<16x3xf32>
    %c0_5 = arith.constant 0 : index
    %c0_6 = arith.constant 0 : index
    %c0_7 = arith.constant 0 : index
    %4 = vector.load %arg4[%c0_5, %c0_6, %c0_7] : memref<1x3x16xf32, #tpu.memory_space<vmem>>, vector<1x3x16xf32>
    %5 = vector.shape_cast %4 : vector<1x3x16xf32> to vector<3x16xf32>
    %cst = arith.constant dense<0.000000e+00> : vector<3xf32>
    %6 = vector.multi_reduction <add>, %1, %cst [1] : vector<3x16xf32> to vector<3xf32>
    %7 = vector.shape_cast %6 : vector<3xf32> to vector<3x1xf32>
    %cst_8 = arith.constant 1.600000e+01 : f32
    %8 = vector.broadcast %cst_8 : f32 to vector<3x1xf32>
    %9 = arith.divf %7, %8 : vector<3x1xf32>
    %10 = vector.broadcast %9 : vector<3x1xf32> to vector<3x16xf32>
    %11 = arith.subf %5, %10 : vector<3x16xf32>
    %12 = arith.mulf %11, %11 : vector<3x16xf32>
    %cst_9 = arith.constant dense<0.000000e+00> : vector<16xf32>
    %13 = vector.multi_reduction <add>, %12, %cst_9 [0] : vector<3x16xf32> to vector<16xf32>
    %14 = vector.shape_cast %13 : vector<16xf32> to vector<1x16xf32>
    %c0_10 = arith.constant 0 : index
    %c0_11 = arith.constant 0 : index
    %15 = vector.load %arg5[%c0_10, %c0_11] : memref<64x1xf32, #tpu.memory_space<vmem>>, vector<64x1xf32>
    %16 = vector.broadcast %15 : vector<64x1xf32> to vector<64x16xf32>
    %17 = vector.broadcast %14 : vector<1x16xf32> to vector<64x16xf32>
    %18 = arith.mulf %16, %17 : vector<64x16xf32>
    %c0_12 = arith.constant 0 : index
    %c0_13 = arith.constant 0 : index
    %19 = vector.load %arg6[%c0_12, %c0_13] : memref<64x1xf32, #tpu.memory_space<vmem>>, vector<64x1xf32>
    %20 = vector.broadcast %19 : vector<64x1xf32> to vector<64x16xf32>
    %21 = arith.addf %18, %20 : vector<64x16xf32>
    %cst_14 = arith.constant 0.000000e+00 : f32
    %22 = vector.broadcast %cst_14 : f32 to vector<64x16xf32>
    %23 = arith.cmpf oge, %21, %22 : vector<64x16xf32>
    %cst_15 = arith.constant 2.000000e-01 : f32
    %24 = vector.broadcast %cst_15 : f32 to vector<64x16xf32>
    %25 = arith.mulf %24, %21 : vector<64x16xf32>
    %26 = arith.select %23, %21, %25 : vector<64x16xi1>, vector<64x16xf32>
    %c0_16 = arith.constant 0 : index
    %c0_17 = arith.constant 0 : index
    %27 = vector.load %arg7[%c0_16, %c0_17] : memref<16x64xf32, #tpu.memory_space<vmem>>, vector<16x64xf32>
    %cst_18 = arith.constant dense<0.000000e+00> : vector<16x16xf32>
    %28 = tpu.matmul %27, %26, %cst_18 {dimension_numbers = #tpu.dot_dimension_numbers<[1], [0], [0], [1], [0, 0, 1, 1], [], []>} : vector<16x64xf32>, vector<64x16xf32>, vector<16x16xf32> -> vector<16x16xf32>
    %c0_19 = arith.constant 0 : index
    %c0_20 = arith.constant 0 : index
    %29 = vector.load %arg8[%c0_19, %c0_20] : memref<16x1xf32, #tpu.memory_space<vmem>>, vector<16x1xf32>
    %30 = vector.broadcast %29 : vector<16x1xf32> to vector<16x16xf32>
    %31 = arith.addf %28, %30 : vector<16x16xf32>
    %cst_21 = arith.constant 0.000000e+00 : f32
    %32 = vector.broadcast %cst_21 : f32 to vector<16x16xf32>
    %33 = arith.cmpf oge, %31, %32 : vector<16x16xf32>
    %cst_22 = arith.constant 2.000000e-01 : f32
    %34 = vector.broadcast %cst_22 : f32 to vector<16x16xf32>
    %35 = arith.mulf %34, %31 : vector<16x16xf32>
    %36 = arith.select %33, %31, %35 : vector<16x16xi1>, vector<16x16xf32>
    %cst_23 = arith.constant 1.000000e-24 : f32
    %37 = vector.broadcast %cst_23 : f32 to vector<1x16xf32>
    %38 = arith.maximumf %14, %37 : vector<1x16xf32>
    %39 = math.rsqrt %38 : vector<1x16xf32>
    %40 = vector.broadcast %39 : vector<1x16xf32> to vector<3x16xf32>
    %41 = arith.mulf %11, %40 : vector<3x16xf32>
    %cst_24 = arith.constant dense<0.000000e+00> : vector<16x16xf32>
    %42 = tpu.matmul %3, %5, %cst_24 {dimension_numbers = #tpu.dot_dimension_numbers<[1], [0], [0], [1], [0, 0, 1, 1], [], []>, precision = #tpu.contract_precision<fp32>} : vector<16x3xf32>, vector<3x16xf32>, vector<16x16xf32> -> vector<16x16xf32>
    %cst_25 = arith.constant dense<0.000000e+00> : vector<16x16xf32>
    %43 = tpu.matmul %3, %41, %cst_25 {dimension_numbers = #tpu.dot_dimension_numbers<[1], [0], [0], [1], [0, 0, 1, 1], [], []>, precision = #tpu.contract_precision<fp32>} : vector<16x3xf32>, vector<3x16xf32>, vector<16x16xf32> -> vector<16x16xf32>
    %44 = arith.mulf %3, %3 : vector<16x3xf32>
    %cst_26 = arith.constant dense<0.000000e+00> : vector<16xf32>
    %45 = vector.multi_reduction <add>, %44, %cst_26 [1] : vector<16x3xf32> to vector<16xf32>
    %46 = vector.shape_cast %45 : vector<16xf32> to vector<16x1xf32>
    %47 = arith.mulf %5, %5 : vector<3x16xf32>
    %cst_27 = arith.constant dense<0.000000e+00> : vector<16xf32>
    %48 = vector.multi_reduction <add>, %47, %cst_27 [0] : vector<3x16xf32> to vector<16xf32>
    %49 = vector.shape_cast %48 : vector<16xf32> to vector<1x16xf32>
    %50 = arith.mulf %41, %5 : vector<3x16xf32>
    %cst_28 = arith.constant dense<0.000000e+00> : vector<16xf32>
    %51 = vector.multi_reduction <add>, %50, %cst_28 [0] : vector<3x16xf32> to vector<16xf32>
    %52 = vector.shape_cast %51 : vector<16xf32> to vector<1x16xf32>
    %53 = vector.broadcast %46 : vector<16x1xf32> to vector<16x16xf32>
    %54 = vector.broadcast %49 : vector<1x16xf32> to vector<16x16xf32>
    %55 = arith.addf %53, %54 : vector<16x16xf32>
    %cst_29 = arith.constant 2.000000e+00 : f32
    %56 = vector.broadcast %cst_29 : f32 to vector<16x16xf32>
    %57 = arith.mulf %56, %42 : vector<16x16xf32>
    %58 = arith.subf %55, %57 : vector<16x16xf32>
    %cst_30 = arith.constant 0.000000e+00 : f32
    %59 = vector.broadcast %cst_30 : f32 to vector<16x16xf32>
    %60 = arith.maximumf %58, %59 : vector<16x16xf32>
    %61 = vector.broadcast %52 : vector<1x16xf32> to vector<16x16xf32>
    %62 = arith.subf %43, %61 : vector<16x16xf32>
    %c16_i32 = arith.constant 16 : i32
    %63 = arith.muli %arg1, %c16_i32 : i32
    %64 = tpu.iota {dimensions = array<i32: 0>} : vector<16x16xi32>
    %65 = tpu.iota {dimensions = array<i32: 1>} : vector<16x16xi32>
    %66 = vector.broadcast %63 : i32 to vector<16x16xi32>
    %67 = arith.addi %65, %66 : vector<16x16xi32>
    %cst_31 = arith.constant 1.000000e-24 : f32
    %68 = vector.broadcast %cst_31 : f32 to vector<16x16xf32>
    %69 = arith.maximumf %60, %68 : vector<16x16xf32>
    %70 = math.rsqrt %69 : vector<16x16xf32>
    %71 = arith.cmpi eq, %64, %67 : vector<16x16xi32>
    %72 = arith.mulf %62, %70 : vector<16x16xf32>
    %cst_32 = arith.constant 0.000000e+00 : f32
    %73 = vector.broadcast %cst_32 : f32 to vector<16x16xf32>
    %74 = arith.select %71, %73, %72 : vector<16x16xi1>, vector<16x16xf32>
    %cst_33 = arith.constant 0.000000e+00 : f32
    %75 = vector.broadcast %cst_33 : f32 to vector<16x16xf32>
    %76 = arith.subf %75, %60 : vector<16x16xf32>
    %cst_34 = arith.constant dense<0xFF800000> : vector<16xf32>
    %77 = vector.multi_reduction <maximumf>, %76, %cst_34 [0] : vector<16x16xf32> to vector<16xf32>
    %78 = vector.shape_cast %77 : vector<16xf32> to vector<1x16xf32>
    %79 = vector.broadcast %78 : vector<1x16xf32> to vector<16x16xf32>
    %80 = arith.cmpf oeq, %76, %79 : vector<16x16xf32>
    %cst_35 = arith.constant 0xFF800000 : f32
    %81 = vector.broadcast %cst_35 : f32 to vector<16x16xf32>
    %82 = arith.select %80, %81, %76 : vector<16x16xi1>, vector<16x16xf32>
    %cst_36 = arith.constant dense<0xFF800000> : vector<16xf32>
    %83 = vector.multi_reduction <maximumf>, %82, %cst_36 [0] : vector<16x16xf32> to vector<16xf32>
    %84 = vector.shape_cast %83 : vector<16xf32> to vector<1x16xf32>
    %85 = vector.broadcast %84 : vector<1x16xf32> to vector<16x16xf32>
    %86 = arith.cmpf oeq, %82, %85 : vector<16x16xf32>
    %cst_37 = arith.constant 0xFF800000 : f32
    %87 = vector.broadcast %cst_37 : f32 to vector<16x16xf32>
    %88 = arith.select %86, %87, %82 : vector<16x16xi1>, vector<16x16xf32>
    %cst_38 = arith.constant dense<0xFF800000> : vector<16xf32>
    %89 = vector.multi_reduction <maximumf>, %88, %cst_38 [0] : vector<16x16xf32> to vector<16xf32>
    %90 = vector.shape_cast %89 : vector<16xf32> to vector<1x16xf32>
    %91 = vector.broadcast %90 : vector<1x16xf32> to vector<16x16xf32>
    %92 = arith.cmpf oeq, %88, %91 : vector<16x16xf32>
    %cst_39 = arith.constant 0xFF800000 : f32
    %93 = vector.broadcast %cst_39 : f32 to vector<16x16xf32>
    %94 = arith.select %92, %93, %88 : vector<16x16xi1>, vector<16x16xf32>
    %cst_40 = arith.constant dense<0xFF800000> : vector<16xf32>
    %95 = vector.multi_reduction <maximumf>, %94, %cst_40 [0] : vector<16x16xf32> to vector<16xf32>
    %96 = vector.shape_cast %95 : vector<16xf32> to vector<1x16xf32>
    %97 = vector.broadcast %96 : vector<1x16xf32> to vector<16x16xf32>
    %98 = arith.cmpf oeq, %94, %97 : vector<16x16xf32>
    %cst_41 = arith.constant 0xFF800000 : f32
    %99 = vector.broadcast %cst_41 : f32 to vector<16x16xf32>
    %100 = arith.select %98, %99, %94 : vector<16x16xi1>, vector<16x16xf32>
    %cst_42 = arith.constant dense<0xFF800000> : vector<16xf32>
    %101 = vector.multi_reduction <maximumf>, %100, %cst_42 [0] : vector<16x16xf32> to vector<16xf32>
    %102 = vector.shape_cast %101 : vector<16xf32> to vector<1x16xf32>
    %103 = vector.broadcast %102 : vector<1x16xf32> to vector<16x16xf32>
    %104 = arith.cmpf oeq, %100, %103 : vector<16x16xf32>
    %cst_43 = arith.constant 0xFF800000 : f32
    %105 = vector.broadcast %cst_43 : f32 to vector<16x16xf32>
    %106 = arith.select %104, %105, %100 : vector<16x16xi1>, vector<16x16xf32>
    %cst_44 = arith.constant 0xFF800000 : f32
    %107 = vector.broadcast %cst_44 : f32 to vector<16x16xf32>
    %108 = arith.cmpf oeq, %106, %107 : vector<16x16xf32>
    %cst_45 = arith.constant 0xFF800000 : f32
    %109 = vector.broadcast %cst_45 : f32 to vector<16x16xf32>
    %110 = arith.select %108, %74, %109 : vector<16x16xi1>, vector<16x16xf32>
    %cst_46 = arith.constant dense<0xFF800000> : vector<16xf32>
    %111 = vector.multi_reduction <maximumf>, %110, %cst_46 [0] : vector<16x16xf32> to vector<16xf32>
    %112 = vector.shape_cast %111 : vector<16xf32> to vector<1x16xf32>
    %cst_47 = arith.constant 0x7F800000 : f32
    %113 = vector.broadcast %cst_47 : f32 to vector<16x16xf32>
    %114 = arith.select %108, %74, %113 : vector<16x16xi1>, vector<16x16xf32>
    %cst_48 = arith.constant dense<0x7F800000> : vector<16xf32>
    %115 = vector.multi_reduction <minimumf>, %114, %cst_48 [0] : vector<16x16xf32> to vector<16xf32>
    %116 = vector.shape_cast %115 : vector<16xf32> to vector<1x16xf32>
    %c0_49 = arith.constant 0 : index
    %c0_50 = arith.constant 0 : index
    %117 = vector.load %arg9[%c0_49, %c0_50] : memref<64x1xf32, #tpu.memory_space<vmem>>, vector<64x1xf32>
    %cst_51 = arith.constant 0.000000e+00 : f32
    %118 = vector.broadcast %cst_51 : f32 to vector<64x1xf32>
    %119 = arith.cmpf ogt, %117, %118 : vector<64x1xf32>
    %120 = vector.shape_cast %119 : vector<64x1xi1> to vector<64x1xi1>
    %121 = vector.broadcast %120 : vector<64x1xi1> to vector<64x16xi1>
    %122 = vector.shape_cast %112 : vector<1x16xf32> to vector<1x16xf32>
    %123 = vector.broadcast %122 : vector<1x16xf32> to vector<64x16xf32>
    %124 = vector.shape_cast %116 : vector<1x16xf32> to vector<1x16xf32>
    %125 = vector.broadcast %124 : vector<1x16xf32> to vector<64x16xf32>
    %126 = arith.select %121, %123, %125 : vector<64x16xi1>, vector<64x16xf32>
    %127 = vector.broadcast %117 : vector<64x1xf32> to vector<64x16xf32>
    %128 = arith.mulf %126, %127 : vector<64x16xf32>
    %c0_52 = arith.constant 0 : index
    %c0_53 = arith.constant 0 : index
    %129 = vector.load %arg10[%c0_52, %c0_53] : memref<64x1xf32, #tpu.memory_space<vmem>>, vector<64x1xf32>
    %130 = vector.broadcast %129 : vector<64x1xf32> to vector<64x16xf32>
    %131 = arith.addf %128, %130 : vector<64x16xf32>
    %cst_54 = arith.constant 0.000000e+00 : f32
    %132 = vector.broadcast %cst_54 : f32 to vector<64x16xf32>
    %133 = arith.cmpf oge, %131, %132 : vector<64x16xf32>
    %cst_55 = arith.constant 2.000000e-01 : f32
    %134 = vector.broadcast %cst_55 : f32 to vector<64x16xf32>
    %135 = arith.mulf %134, %131 : vector<64x16xf32>
    %136 = arith.select %133, %131, %135 : vector<64x16xi1>, vector<64x16xf32>
    %c0_56 = arith.constant 0 : index
    %c0_57 = arith.constant 0 : index
    %137 = vector.load %arg11[%c0_56, %c0_57] : memref<16x64xf32, #tpu.memory_space<vmem>>, vector<16x64xf32>
    %cst_58 = arith.constant dense<0.000000e+00> : vector<16x16xf32>
    %138 = tpu.matmul %137, %136, %cst_58 {dimension_numbers = #tpu.dot_dimension_numbers<[1], [0], [0], [1], [0, 0, 1, 1], [], []>} : vector<16x64xf32>, vector<64x16xf32>, vector<16x16xf32> -> vector<16x16xf32>
    %c0_59 = arith.constant 0 : index
    %c0_60 = arith.constant 0 : index
    %139 = vector.load %arg12[%c0_59, %c0_60] : memref<16x1xf32, #tpu.memory_space<vmem>>, vector<16x1xf32>
    %140 = vector.broadcast %139 : vector<16x1xf32> to vector<16x16xf32>
    %141 = arith.addf %138, %140 : vector<16x16xf32>
    %cst_61 = arith.constant 0.000000e+00 : f32
    %142 = vector.broadcast %cst_61 : f32 to vector<16x16xf32>
    %143 = arith.cmpf oge, %141, %142 : vector<16x16xf32>
    %cst_62 = arith.constant 2.000000e-01 : f32
    %144 = vector.broadcast %cst_62 : f32 to vector<16x16xf32>
    %145 = arith.mulf %144, %141 : vector<16x16xf32>
    %146 = arith.select %143, %141, %145 : vector<16x16xi1>, vector<16x16xf32>
    %c0_63 = arith.constant 0 : index
    %c0_64 = arith.constant 0 : index
    %c0_65 = arith.constant 0 : index
    %147 = vector.load %arg13[%c0_63, %c0_64, %c0_65] : memref<1x32x16xf32, #tpu.memory_space<vmem>>, vector<1x16x16xf32>
    %148 = vector.shape_cast %147 : vector<1x16x16xf32> to vector<16x16xf32>
    %149 = vector.shape_cast %36 : vector<16x16xf32> to vector<1x16x16xf32>
    tpu.vector_store %arg13[%c0_63, %c0_64, %c0_65], %149 {strides = array<i32>} : memref<1x32x16xf32, #tpu.memory_space<vmem>>, vector<1x16x16xf32>,
    %c0_66 = arith.constant 0 : index
    %c16 = arith.constant 16 : index
    %c0_67 = arith.constant 0 : index
    %150 = vector.load %arg13[%c0_66, %c16, %c0_67] : memref<1x32x16xf32, #tpu.memory_space<vmem>>, vector<1x16x16xf32>
    %151 = vector.shape_cast %150 : vector<1x16x16xf32> to vector<16x16xf32>
    %152 = vector.shape_cast %146 : vector<16x16xf32> to vector<1x16x16xf32>
    tpu.vector_store %arg13[%c0_66, %c16, %c0_67], %152 {strides = array<i32>} : memref<1x32x16xf32, #tpu.memory_space<vmem>>, vector<1x16x16xf32>,
    return
  }
  func.func @transform_0(%arg0: i32, %arg1: i32) -> (i32, i32, i32) {
    %c0_i32 = arith.constant 0 : i32
    %c0_i32_0 = arith.constant 0 : i32
    %c0_i32_1 = arith.constant 0 : i32
    return %arg0, %c0_i32, %c0_i32_0 : i32, i32, i32
  }
  func.func @transform_1(%arg0: i32, %arg1: i32) -> (i32, i32, i32) {
    %c0_i32 = arith.constant 0 : i32
    %c0_i32_0 = arith.constant 0 : i32
    %c0_i32_1 = arith.constant 0 : i32
    return %arg0, %c0_i32, %c0_i32_0 : i32, i32, i32
  }
  func.func @transform_2(%arg0: i32, %arg1: i32) -> (i32, i32, i32) {
    %c0_i32 = arith.constant 0 : i32
    %c0_i32_0 = arith.constant 0 : i32
    return %arg0, %c0_i32, %arg1 : i32, i32, i32
  }
  func.func @transform_3(%arg0: i32, %arg1: i32) -> (i32, i32) {
    %c0_i32 = arith.constant 0 : i32
    %c0_i32_0 = arith.constant 0 : i32
    %c0_i32_1 = arith.constant 0 : i32
    return %c0_i32, %c0_i32_0 : i32, i32
  }
  func.func @transform_4(%arg0: i32, %arg1: i32) -> (i32, i32) {
    %c0_i32 = arith.constant 0 : i32
    %c0_i32_0 = arith.constant 0 : i32
    %c0_i32_1 = arith.constant 0 : i32
    return %c0_i32, %c0_i32_0 : i32, i32
  }
  func.func @transform_5(%arg0: i32, %arg1: i32) -> (i32, i32) {
    %c0_i32 = arith.constant 0 : i32
    %c0_i32_0 = arith.constant 0 : i32
    %c0_i32_1 = arith.constant 0 : i32
    return %c0_i32, %c0_i32_0 : i32, i32
  }
  func.func @transform_6(%arg0: i32, %arg1: i32) -> (i32, i32) {
    %c0_i32 = arith.constant 0 : i32
    %c0_i32_0 = arith.constant 0 : i32
    %c0_i32_1 = arith.constant 0 : i32
    return %c0_i32, %c0_i32_0 : i32, i32
  }
  func.func @transform_7(%arg0: i32, %arg1: i32) -> (i32, i32) {
    %c0_i32 = arith.constant 0 : i32
    %c0_i32_0 = arith.constant 0 : i32
    %c0_i32_1 = arith.constant 0 : i32
    return %c0_i32, %c0_i32_0 : i32, i32
  }
  func.func @transform_8(%arg0: i32, %arg1: i32) -> (i32, i32) {
    %c0_i32 = arith.constant 0 : i32
    %c0_i32_0 = arith.constant 0 : i32
    %c0_i32_1 = arith.constant 0 : i32
    return %c0_i32, %c0_i32_0 : i32, i32
  }
  func.func @transform_9(%arg0: i32, %arg1: i32) -> (i32, i32) {
    %c0_i32 = arith.constant 0 : i32
    %c0_i32_0 = arith.constant 0 : i32
    %c0_i32_1 = arith.constant 0 : i32
    return %c0_i32, %c0_i32_0 : i32, i32
  }
  func.func @transform_10(%arg0: i32, %arg1: i32) -> (i32, i32) {
    %c0_i32 = arith.constant 0 : i32
    %c0_i32_0 = arith.constant 0 : i32
    %c0_i32_1 = arith.constant 0 : i32
    return %c0_i32, %c0_i32_0 : i32, i32
  }
  func.func @transform_11(%arg0: i32, %arg1: i32) -> (i32, i32, i32) {
    %c0_i32 = arith.constant 0 : i32
    %c0_i32_0 = arith.constant 0 : i32
    return %arg0, %c0_i32, %arg1 : i32, i32, i32
  }
}

</mosaic_0001>

<bundles_post_ra>
// kernel: tpu_custom_call.1
= control target key start
LH: loop header
LB: loop body
LE: loop exit
PB: predicated region body
PF: predicated region fallthrough
CT: control target
= control target key end

     0   :  { %s1697_s17 = smov 0   ;;  %s1699_s18 = smov 0   ;;  %s2088_s0 = inlined_call_operand.vmem [shape: f32[2,3,16], index: 0, kind: input, shape index: {}]   ;;  %s2089_s1 = inlined_call_operand.vmem [shape: f32[2,16,3], index: 1, kind: input, shape index: {}]   ;;  %s2090_s2 = inlined_call_operand.vmem [shape: f32[2,3,16], index: 2, kind: input, shape index: {}]   ;;  %s2091_s3 = inlined_call_operand.vmem [shape: f32[64,1], index: 3, kind: input, shape index: {}]   ;;  %s2092_s4 = inlined_call_operand.vmem [shape: f32[64,1], index: 4, kind: input, shape index: {}]   ;;  %s2093_s5 = inlined_call_operand.vmem [shape: f32[16,64], index: 5, kind: input, shape index: {}]   ;;  %s2094_s6 = inlined_call_operand.vmem [shape: f32[16,1], index: 6, kind: input, shape index: {}]   ;;  %s2095_s7 = inlined_call_operand.vmem [shape: f32[64,1], index: 7, kind: input, shape index: {}]   ;;  %s2096_s8 = inlined_call_operand.vmem [shape: f32[64,1], index: 8, kind: input, shape index: {}]   ;;  %s2097_s9 = inlined_call_operand.vmem [shape: f32[16,64], index: 9, kind: input, shape index: {}]   ;;  %s2098_s10 = inlined_call_operand.vmem [shape: f32[16,1], index: 10, kind: input, shape index: {}]   ;;  %s2099_s11 = inlined_call_operand.vmem [shape: f32[2,32,16], index: 11, kind: output, shape index: {}]  }
   0x1   :  { %s1701_s19 = smov 0  }
   0x2 LB: > { %s33_s20 = sadd.s32 1, %s1629_s18  ;;  %p1558_p0 = scmp.ge.s32.totalorder %s1633_s19, 1  ;;  %s1633_s19 = sphi %s1701_s19, %s21_s19   ;;  %s1629_s18 = sphi %s1699_s18, %s2101_s18   ;;  %s1625_s17 = sphi %s1697_s17, %s2100_s17  }
   0x3   : > { %p35_p1 = scmp.ge.s32.totalorder %s33_s20, 2  ;;  %p374_p2 = scmp.lt.s32.totalorder %s1633_s19, 3 }
   0x5   : > { %s2103_s20 = smov (%p35_p1, %s33_s20), 0  ;;  %p375_p3 = pnand %p1558_p0, %p374_p2 }
   0x6   : > { %p428_p4 = scmp.lt.s32.totalorder (!%p375_p3), %s1625_s17, 1 }
   0x7   : > { %378 = sbr.rel (%p375_p3) target bundleno = 545 (0x221), region = 64 }
   0xc   : > { %v483_v0 = vld [vmem:[%s2091_s3 + $0x30] sm:$0xff]  ;;  %v482_v1 = vld [vmem:[%s2091_s3 + $0x28] sm:$0xff]  ;;  %v1635_v2 = vmov 0   ;;  %s2105_s17 = smov (!%p428_p4, %s1625_s17), 1  ;;  %vm456_vm0 = vcmask 124928   ;;  %vm675_vm1 = vcmask 23552  }
   0xd   : > { %1602 = vset.pattern.permute.xlu2 %v1635_v2  ;;  %1601 = vset.pattern.permute.xlu1 %v1635_v2  ;;  %s1559_s25 = sshll.u32 %s2105_s17, 2  ;;  %s1571_s26 = sshll.u32 %s2105_s17, 4  ;;  %vm682_vm2 = vcmask 1042432   ;;  %v540_v7 = vld [vmem:[%s2092_s4 + $0x38] sm:$0xff]  ;;  %v539_v8 = vld [vmem:[%s2092_s4 + $0x30] sm:$0xff]  ;;  %v538_v20 = vld [vmem:[%s2092_s4 + $0x28] sm:$0xff] }
   0xe   : > { %517 = vperm.xlu1 %1601, %v483_v0   ;;  %512 = vperm.xlu2 %1602, %v482_v1   ;;  %s431_s29 = scalar_lea.vmem %s2088_s0, %s1559_s25  ;;  %s436_s13 = scalar_lea.vmem %s2089_s1, %s1571_s26  ;;  %v481_v21 = vld [vmem:[%s2091_s3 + $0x20] sm:$0xff]  ;;  %v480_v29 = vld [vmem:[%s2091_s3 + $0x18] sm:$0xff]  ;;  %v479_v34 = vld [vmem:[%s2091_s3 + $0x10] sm:$0xff]  ;;  %v1636_v53 = vmov 16.0  }
   0xf   : > { %1600 = vset.pattern.permute.xlu0 %v1635_v2  ;;  %s443_s16 = scalar_lea.vmem %s2090_s2, %s1559_s25  ;;  %v452_v3 = vld [vmem:[%s431_s29] sm:$0x7]  ;;  %v1737_v4 = vld [vmem:[%s436_s13 + $0x8] sm:$0xff]  ;;  %v484_v31 = vld [vmem:[%s2091_s3 + $0x38] sm:$0xff]  ;;  %1603 = vrcp.f32 %v1636_v53  ;;  %s1572_s14 = sshll.u32 %s2105_s17, 5 }
  0x10   : > { %v1739_v5 = vld [vmem:[%s443_s16] sm:$0x7]  ;;  %v457_v6 = vsel %vm456_vm0, %v452_v3, 0.0  ;;  %v680_v9 = vsel %vm675_vm1, %v1737_v4, 0  ;;  %v536_v33 = vld [vmem:[%s2092_s4 + $0x18] sm:$0xff]  ;;  %v535_v36 = vld [vmem:[%s2092_s4 + $0x10] sm:$0xff]  ;;  %v1044_v43 = vmul.f32 %v1737_v4, %v1737_v4  ;;  %s2000_s21 = scalar_lea.vmem %s2099_s11, %s1572_s14 }
  0x11   : > { %v684_v10 = vsel %vm682_vm2, %v1739_v5, 0  ;;  %458 = vadd.xlane.f32.xlu0 %v457_v6  ;;  %v1752_v11 = vand.u32 4294901760, %v680_v9  ;;  %v1754_v13 = vld [vmem:[%s436_s13] sm:$0xff]  ;;  %v478_v37 = vld [vmem:[%s2091_s3 + $0x8] sm:$0xff]  ;;  %v1212_v40 = vld [vmem:[%s2095_s7 + $0x38] sm:$0xff] }
  0x12   : > { %v701_v12 = vand.u32 4294901760, %v684_v10  ;;  %v677_v17 = vsel %vm675_vm1, %v1754_v13, 0  ;;  %v537_v28 = vld [vmem:[%s2092_s4 + $0x20] sm:$0xff]  ;;  %v534_v39 = vld [vmem:[%s2092_s4 + $0x8] sm:$0xff]  ;;  %vm1220_vm3 = vcmp.gt.f32.partialorder %v1212_v40, 0.0  ;;  %v1211_v42 = vld [vmem:[%s2095_s7 + $0x30] sm:$0xff]  ;;  %v1043_v46 = vmul.f32 %v1754_v13, %v1754_v13 }
  0x13   : > { %v1757_v14 = vsub.f32 %v680_v9, %v1752_v11  ;;  %v1772_v23 = vand.u32 4294901760, %v677_v17  ;;  %v477_v35 = vld [vmem:[%s2091_s3] sm:$0xff]  ;;  %v1228_v41 = vsel %vm1220_vm3, 1, %v1635_v2  ;;  %v1048_v44 = vsel %vm675_vm1, %v1044_v43, 0.0  ;;  %v1210_v47 = vld [vmem:[%s2095_s7 + $0x28] sm:$0xff]  ;;  %v1324_v51 = vld [vmem:[%s2096_s8 + $0x38] sm:$0xff] }
  0x14   : > { %1573 = vmatpush.msra.mxu3 %v701_v12  ;;  %v736_v15 = vsub.f32 %v684_v10, %v701_v12  ;;  %702 = vmatpush.msra.mxu1 %v701_v12  ;;  %v533_v38 = vld [vmem:[%s2092_s4] sm:$0xff]  ;;  %vm1219_vm4 = vcmp.gt.f32.partialorder %v1211_v42, 0.0  ;;  %v1045_v48 = vsel %vm675_vm1, %v1043_v46, 0.0  ;;  %vm1218_vm5 = vcmp.gt.f32.partialorder %v1210_v47, 0.0  ;;  %v1323_v56 = vld [vmem:[%s2096_s8 + $0x30] sm:$0xff]  ;;  %v1208_v57 = vld [vmem:[%s2095_s7 + $0x18] sm:$0xff] }
  0x15   : > { %v1760_v16 = vand.u32 4294901760, %v1757_v14  ;;  %v1779_v26 = vsub.f32 %v677_v17, %v1772_v23  ;;  %v1227_v45 = vsel %vm1219_vm4, 1, %v1635_v2  ;;  %v1226_v49 = vsel %vm1218_vm5, 1, %v1635_v2  ;;  %v1209_v50 = vld [vmem:[%s2095_s7 + $0x20] sm:$0xff]  ;;  %v1604_v55 = vpop.eup %1603  ;;  %v1207_v0 = vld [vmem:[%s2095_s7 + $0x10] sm:$0xff]  ;;  %v1322_v3 = vld [vmem:[%s2096_s8 + $0x28] sm:$0xff] }
  0x16   : > { %578 = vperm.xlu1 %1601, %v540_v7   ;;  %573 = vperm.xlu2 %1602, %v539_v8   ;;  %v737_v18 = vand.u32 4294901760, %v736_v15  ;;  %vm1217_vm6 = vcmp.gt.f32.partialorder %v1209_v50, 0.0  ;;  %v461_v58 = vmul.f32 16.0, %v1604_v55  ;;  %vm1216_vm7 = vcmp.gt.f32.partialorder %v1208_v57, 0.0  ;;  %v616_v43 = vld [vmem:[%s2094_s6 + $0x8] sm:$0xff] }
  0x17   : > { %795 = vmatpush.msrb.mxu1 %v701_v12  ;;  %767 = vmatpush.msrb.mxu3 %v736_v15  ;;  %v714_v19 = vsub.f32 %v1757_v14, %v1760_v16  ;;  %v1782_v27 = vand.u32 4294901760, %v1779_v26  ;;  %v1225_v52 = vsel %vm1217_vm6, 1, %v1635_v2  ;;  %v1224_v61 = vsel %vm1216_vm7, 1, %v1635_v2 }
  0x18   : > { %v738_v22 = vsub.f32 %v736_v15, %v737_v18  ;;  %v462_v59 = vsub.f32 1.0, %v461_v58  ;;  %vm465_vm8 = vweird.f32 %v1604_v55  ;;  %vm1215_vm9 = vcmp.gt.f32.partialorder %v1207_v0, 0.0  ;;  %v1321_v15 = vld [vmem:[%s2096_s8 + $0x20] sm:$0xff] }
  0x19   : > { %v1774_v24 = vand.u32 4294901760, %v714_v19  ;;  %v706_v30 = vsub.f32 %v1779_v26, %v1782_v27  ;;  %v1223_v7 = vsel %vm1215_vm9, 1, %v1635_v2  ;;  %vm1115_vm9 = vcmask 130048  }
  0x1a   : > { %v739_v25 = vand.u32 4294901760, %v738_v22  ;;  %v463_v62 = vmul.f32 %v1604_v55, %v462_v59 }
  0x1b   : > { %716 = vmatmul.f32.vlgmr.msra.gmra.mxu3 %v1774_v24  ;;  %v1795_v32 = vand.u32 4294901760, %v706_v30  ;;  %v1320_v30 = vld [vmem:[%s2096_s8 + $0x18] sm:$0xff] }
  0x1c   : > { %740 = vmatpush.msra.mxu2 %v739_v25  ;;  %853 = vmatpush.msra.mxu3 %v701_v12  ;;  %v464_v1 = vadd.f32 %v1604_v55, %v463_v62  ;;  %v1206_v12 = vld [vmem:[%s2095_s7 + $0x8] sm:$0xff]  ;;  %v1205_v25 = vld [vmem:[%s2095_s7] sm:$0xff] }
  0x1d   : > { %742 = vmatmul.f32.vlgmr.msra.gmra.mxu2 %v1772_v23  ;;  %708 = vmatmul.f32.vlgmr.msra.gmra.mxu1 %v1795_v32  ;;  %vm1214_vm10 = vcmp.gt.f32.partialorder %v1206_v12, 0.0  ;;  %vm1213_vm11 = vcmp.gt.f32.partialorder %v1205_v25, 0.0 }
  0x1e   : > { %568 = vperm.xlu2 %1602, %v538_v20   ;;  %507 = vperm.xlu1 %1601, %v481_v21   ;;  %v466_v6 = vsel %vm465_vm8, %v1604_v55, %v464_v1  ;;  %v1222_v19 = vsel %vm1214_vm10, 1, %v1635_v2 }
  0x1f   : > { %827 = vmatpush.msrb.mxu2 %v737_v18 }
  0x23   : > { %770 = vmatmul.f32.vlgmr.msrb.gmra.mxu3 %v1779_v26 }
  0x25   : > { %522 = vperm.xlu0 %1600, %v484_v31   ;;  %746 = vmatmul.f32.gmra.mxu2 %v1752_v11  ;;  %v1318_v31 = vld [vmem:[%s2096_s8 + $0x8] sm:$0xff] }
  0x26   : > { %563 = vperm.xlu2 %1602, %v537_v28   ;;  %502 = vperm.xlu1 %1601, %v480_v29  }
  0x27   : > { %799 = vmatmul.f32.vlgmr.msrb.gmra.mxu1 %v1782_v27 }
  0x2b   : > { %775 = vmatmul.f32.gmra.mxu3 %v1757_v14 }
  0x2d   : > { %487 = vperm.xlu0 %1600, %v477_v35   ;;  %829 = vmatmul.f32.vlgmr.msrb.gmra.mxu2 %v1772_v23 }
  0x2e   : > { %558 = vperm.xlu2 %1602, %v536_v33   ;;  %497 = vperm.xlu1 %1601, %v479_v34   ;;  %v1221_v34 = vsel %vm1213_vm11, 1, %v1635_v2 }
  0x2f   : > { %805 = vmatmul.f32.gmra.mxu1 %v1760_v16 }
  0x33   : > { %855 = vmatmul.f32.vlgmr.msra.gmra.mxu3 %v1772_v23 }
  0x35   : > { %833 = vmatmul.f32.gmra.mxu2 %v1752_v11 }
  0x36   : > { %553 = vperm.xlu2 %1602, %v535_v36   ;;  %492 = vperm.xlu1 %1601, %v478_v37  }
  0x3b   : > { %859 = vmatmul.f32.gmra.mxu3 %v1752_v11 }
  0x3e   : > { %543 = vperm.xlu2 %1602, %v533_v38   ;;  %548 = vperm.xlu1 %1601, %v534_v39  }
  0x46   : > { %1251 = vperm.xlu2 %1602, %v1228_v41  }
  0x4e   : > { %1248 = vperm.xlu2 %1602, %v1227_v45  }
  0x56   : > { %1306 = vperm.xlu2 %1602, %v1212_v40  }
  0x57   : > { %1046 = vadd.xlane.f32.xlu0 %v1045_v48 }
  0x5e   : > { %1245 = vperm.xlu2 %1602, %v1226_v49  }
  0x66   : > { %1301 = vperm.xlu2 %1602, %v1211_v42   ;;  %v1319_v42 = vld [vmem:[%s2096_s8 + $0x10] sm:$0xff] }
  0x68   : > { %1049 = vadd.xlane.f32.xlu1 %v1048_v44  ;;  %v1853_v54 = vpop.permute.xlu2 %512 }
  0x6b   : > { %1242 = vperm.xlu0 %1600, %v1225_v52  }
  0x6e   : > { %1362 = vperm.xlu2 %1602, %v1324_v51  }
  0x70   : > { %v574_v60 = vpop.permute.xlu2 %573 }
  0x73   : > { %1291 = vperm.xlu0 %1600, %v1209_v50  }
  0x76   : > { %1357 = vperm.xlu2 %1602, %v1323_v56  }
  0x78   : > { %v569_v4 = vpop.permute.xlu2 %568 }
  0x7b   : > { %1286 = vperm.xlu0 %1600, %v1208_v57  }
  0x7e   : > { %1239 = vperm.xlu2 %1602, %v1224_v61  }
  0x80   : > { %v518_v63 = vpop.permute.xlu1 %517  ;;  %v564_v20 = vpop.permute.xlu2 %563 }
  0x81   : > { %1296 = vperm.xlu1 %1601, %v1210_v47  }
  0x83   : > { %1281 = vperm.xlu0 %1600, %v1207_v0  }
  0x84   : > { %v459_v8 = vpop.xlane.xlu0 %458 }
  0x85   : > { %v467_v9 = vmul.f32 %v466_v6, %v459_v8 }
  0x86   : > { %1352 = vperm.xlu2 %1602, %v1322_v3  }
  0x87   : > { %v1873_v13 = vsub.f32 %v1739_v5, %v467_v9 }
  0x88   : > { %v579_v10 = vpop.permute.xlu1 %578  ;;  %v559_v38 = vpop.permute.xlu2 %558 }
  0x89   : > { %1236 = vperm.xlu1 %1601, %v1223_v7   ;;  %v469_v17 = vmul.f32 %v1873_v13, %v1873_v13 }
  0x8b   : > { %v470_v18 = vsel %vm456_vm0, %v469_v17, 0.0  ;;  %1276 = vperm.xlu0 %1600, %v1206_v12  }
  0x8c   : > { %v471_v21 = vrot.slane %v470_v18, 4 }
  0x8e   : > { %1347 = vperm.xlu2 %1602, %v1321_v15   ;;  %v472_v28 = vadd.f32 %v471_v21, %v470_v18 }
  0x90   : > { %v508_v22 = vpop.permute.xlu1 %507  ;;  %v473_v29 = vrot.slane %v472_v28, 2  ;;  %v554_v59 = vpop.permute.xlu2 %553 }
  0x91   : > { %1233 = vperm.xlu1 %1601, %v1222_v19   ;;  %v1399_v19 = vld [vmem:[%s2098_s10] sm:$0xff] }
  0x92   : > { %v474_v33 = vadd.f32 %v473_v29, %v472_v28  ;;  %v1400_v29 = vld [vmem:[%s2098_s10 + $0x8] sm:$0xff] }
  0x93   : > { %1332 = vperm.xlu0 %1600, %v1318_v31  }
  0x94   : > { %v475_v35 = vrot.slane %v474_v33, 1 }
  0x96   : > { %1342 = vperm.xlu2 %1602, %v1320_v30   ;;  %v1892_v37 = vadd.f32 %v475_v35, %v474_v33 }
  0x97   : > { %v523_v39 = vpop.permute.xlu0 %522 }
  0x98   : > { %v503_v36 = vpop.permute.xlu1 %502  ;;  %v663_v40 = vmax.f32 %v1892_v37, 1e-24  ;;  %v532_v41 = vmul.f32 %v523_v39, %v1892_v37  ;;  %v529_v2 = vmul.f32 %v508_v22, %v1892_v37  ;;  %v531_v44 = vmul.f32 %v518_v63, %v1892_v37  ;;  %v544_v28 = vpop.permute.xlu2 %543 }
  0x99   : > { %1230 = vperm.xlu1 %1601, %v1221_v34   ;;  %v530_v45 = vmul.f32 %v1853_v54, %v1892_v37  ;;  %v528_v46 = vmul.f32 %v503_v36, %v1892_v37 }
  0x9a   : > { %1605 = vrsqrt.f32 %v663_v40  ;;  %v588_v47 = vadd.f32 %v579_v10, %v532_v41  ;;  %v587_v48 = vadd.f32 %v574_v60, %v531_v44  ;;  %v585_v50 = vadd.f32 %v564_v20, %v529_v2  ;;  %v1317_v60 = vld [vmem:[%s2096_s8] sm:$0xff] }
  0x9b   : > { %624 = vperm.xlu0 %1600, %v616_v43   ;;  %v586_v49 = vadd.f32 %v569_v4, %v530_v45  ;;  %v584_v56 = vadd.f32 %v559_v38, %v528_v46  ;;  %v615_v4 = vld [vmem:[%s2094_s6] sm:$0xff]  ;;  %vm670_vm5 = vweird.f32 %v663_v40  ;;  %v709_v46 = vpop.f32.mrf.mxu1 }
  0x9c   : > { %vm596_vm12 = vcmp.ge.f32.partialorder %v588_v47, 0.0  ;;  %v604_v52 = vmul.f32 0.2, %v588_v47  ;;  %v603_v53 = vmul.f32 0.2, %v587_v48  ;;  %vm595_vm13 = vcmp.ge.f32.partialorder %v587_v48, 0.0 }
  0x9d   : > { %v602_v54 = vmul.f32 0.2, %v586_v49  ;;  %vm594_vm14 = vcmp.ge.f32.partialorder %v586_v49, 0.0  ;;  %v601_v0 = vmul.f32 0.2, %v585_v50  ;;  %vm593_vm15 = vcmp.ge.f32.partialorder %v585_v50, 0.0 }
  0x9e   : > { %1337 = vperm.xlu2 %1602, %v1319_v42   ;;  %v612_v57 = vsel %vm596_vm12, %v588_v47, %v604_v52  ;;  %v611_v63 = vsel %vm595_vm13, %v587_v48, %v603_v53  ;;  %v600_v6 = vmul.f32 0.2, %v584_v56  ;;  %vm592_vm1 = vcmp.ge.f32.partialorder %v584_v56, 0.0  ;;  %v717_v20 = vpop.f32.mrf.mxu3 }
  0x9f   : > { %642 = vmatpush.msra.mxu0 %v612_v57  ;;  %v610_v3 = vsel %vm594_vm14, %v586_v49, %v602_v54  ;;  %v488_v8 = vpop.permute.xlu0 %487  ;;  %v609_v10 = vsel %vm593_vm15, %v585_v50, %v601_v0 }
  0xa0   : > { %v498_v51 = vpop.permute.xlu1 %497  ;;  %v1606_v58 = vpop.eup %1605  ;;  %v608_v17 = vsel %vm592_vm1, %v584_v56, %v600_v6  ;;  %v525_v18 = vmul.f32 %v488_v8, %v1892_v37 }
  0xa1   : > { %v527_v55 = vmul.f32 %v498_v51, %v1892_v37  ;;  %1271 = vperm.xlu1 %1601, %v1205_v25   ;;  %v665_v61 = vmul.f32 %v1606_v58, %v663_v40  ;;  %643 = vmatpush.msra.mxu0 %v611_v63  ;;  %vm671_vm4 = vweird.f32 %v1606_v58  ;;  %v743_v38 = vpop.f32.mrf.mxu2  ;;  %v1051_v40 = vmul.f32 %v1739_v5, %v1739_v5  ;;  %v614_v51 = vld [vmem:[%s2093_s5 + $0x8] sm:$0xff] }
  0xa2   : > { %vm672_vm6 = vmor %vm670_vm5, %vm671_vm4  ;;  %v581_v31 = vadd.f32 %v544_v28, %v525_v18 }
  0xa3   : > { %v583_v62 = vadd.f32 %v554_v59, %v527_v55  ;;  %v666_v1 = vmul.f32 %v1606_v58, %v665_v61  ;;  %644 = vmatpush.msra.mxu0 %v610_v3  ;;  %v1052_v47 = vsel %vm456_vm0, %v1051_v40, 0.0 }
  0xa4   : > { %v597_v42 = vmul.f32 0.2, %v581_v31  ;;  %vm589_vm8 = vcmp.ge.f32.partialorder %v581_v31, 0.0  ;;  %v1053_v49 = vrot.slane %v1052_v47, 4  ;;  %v800_v55 = vpop.f32.mrf.mxu1 }
  0xa5   : > { %v667_v7 = vmul.f32 0.5, %v666_v1  ;;  %v599_v12 = vmul.f32 0.2, %v583_v62  ;;  %645 = vmatpush.msra.mxu0 %v609_v10  ;;  %vm591_vm3 = vcmp.ge.f32.partialorder %v583_v62, 0.0 }
  0xa6   : > { %1327 = vperm.xlu2 %1602, %v1317_v60   ;;  %v771_v2 = vpop.f32.mrf.mxu3  ;;  %v605_v45 = vsel %vm589_vm8, %v581_v31, %v597_v42  ;;  %v1054_v52 = vadd.f32 %v1053_v49, %v1052_v47 }
  0xa7   : > { %v668_v15 = vsub.f32 1.5, %v667_v7  ;;  %646 = vmatpush.msra.mxu0 %v608_v17  ;;  %v607_v22 = vsel %vm591_vm3, %v583_v62, %v599_v12 }
  0xa8   : > { %v493_v9 = vpop.permute.xlu1 %492  ;;  %v1055_v57 = vrot.slane %v1054_v52, 2 }
  0xa9   : > { %619 = vperm.xlu1 %1601, %v615_v4   ;;  %v669_v21 = vmul.f32 %v1606_v58, %v668_v15  ;;  %647 = vmatpush.msra.mxu0 %v607_v22  ;;  %v526_v33 = vmul.f32 %v493_v9, %v1892_v37  ;;  %v613_v37 = vld [vmem:[%s2093_s5] sm:$0xff]  ;;  %v747_v50 = vpop.f32.mrf.mxu2 }
  0xab   : > { %v673_v25 = vsel %vm672_vm6, %v1606_v58, %v669_v21  ;;  %v748_v58 = vadd.f32 %v747_v50, %v717_v20 }
  0xac   : > { %v1922_v30 = vmul.f32 %v673_v25, %v1873_v13  ;;  %v806_v0 = vpop.f32.mrf.mxu1 }
  0xae   : > { %1403 = vperm.xlu2 %1602, %v1399_v19   ;;  %v864_v35 = vsel %vm682_vm2, %v1922_v30, 0  ;;  %vm627_vm2 = vcmask 523264   ;;  %v776_v53 = vpop.f32.mrf.mxu3 }
  0xaf   : > { %v881_v39 = vand.u32 4294901760, %v864_v35  ;;  %v777_v61 = vadd.f32 %v776_v53, %v748_v58 }
  0xb0   : > { %v549_v34 = vpop.permute.xlu1 %548 }
  0xb1   : > { %v582_v36 = vadd.f32 %v549_v34, %v526_v33  ;;  %1408 = vperm.xlu1 %1601, %v1400_v29   ;;  %975 = vmatpush.msrb.mxu3 %v881_v39  ;;  %v916_v13 = vsub.f32 %v864_v35, %v881_v39  ;;  %v830_v54 = vpop.f32.mrf.mxu2 }
  0xb2   : > { %979 = vmatmul.f32.vlgmr.msrb.gmra.mxu3 %v1782_v27 }
  0xb3   : > { %vm590_vm7 = vcmp.ge.f32.partialorder %v582_v36, 0.0  ;;  %v598_v41 = vmul.f32 0.2, %v582_v36  ;;  %947 = vmatpush.msra.mxu2 %v916_v13  ;;  %v917_v44 = vand.u32 4294901760, %v916_v13 }
  0xb4   : > { %950 = vmatmul.f32.vlgmr.msra.gmra.mxu2 %v1779_v26  ;;  %v744_v26 = vadd.f32 %v743_v38, %v709_v46 }
  0xb5   : > { %v606_v43 = vsel %vm590_vm7, %v582_v36, %v598_v41  ;;  %v918_v48 = vsub.f32 %v916_v13, %v917_v44 }
  0xb6   : > { %648 = vmatpush.msra.mxu0 %v606_v43  ;;  %v772_v56 = vadd.f32 %v771_v2, %v744_v26  ;;  %v856_v60 = vpop.f32.mrf.mxu3  ;;  %v1966_v26 = vpop.permute.xlu2 %1251 }
  0xb7   : > { %v919_v27 = vand.u32 4294901760, %v918_v48 }
  0xb8   : > { %649 = vmatpush.msra.mxu0 %v605_v45  ;;  %v801_v59 = vadd.f32 %v800_v55, %v772_v56 }
  0xb9   : > { %1565 = vmatmul.msk.f32.vlgmr.msra.gmra.mxu0 %vm627_vm2, %v613_v37  ;;  %920 = vmatpush.msra.mxu1 %v919_v27  ;;  %v834_v4 = vpop.f32.mrf.mxu2 }
  0xba   : > { %882 = vmatpush.msrb.mxu0 %v881_v39  ;;  %985 = vmatmul.f32.gmra.mxu3 %v1760_v16  ;;  %v1056_v16 = vadd.f32 %v1055_v57, %v1054_v52  ;;  %v831_v62 = vadd.f32 %v830_v54, %v801_v59 }
  0xbb   : > { %1033 = vmatpush.msrb.mxu1 %v881_v39 }
  0xbc   : > { %1007 = vmatpush.msra.mxu0 %v917_v44  ;;  %922 = vmatmul.f32.vlgmr.msra.gmra.mxu1 %v1772_v23  ;;  %v1057_v63 = vrot.slane %v1056_v16, 1  ;;  %v857_v1 = vadd.f32 %v856_v60, %v831_v62 }
  0xbd   : > { %955 = vmatmul.f32.gmra.mxu2 %v1757_v14  ;;  %v807_v14 = vadd.f32 %v806_v0, %v777_v61 }
  0xbe   : > { %v1058_v3 = vadd.f32 %v1057_v63, %v1056_v16  ;;  %v1069_v7 = vmul.f32 2.0, %v857_v1  ;;  %v860_v10 = vpop.f32.mrf.mxu3  ;;  %v1972_v59 = vpop.permute.xlu2 %1248 }
  0xbf   : > { %v835_v8 = vadd.f32 %v834_v4, %v807_v14 }
  0xc1   : > { %1566 = vmatmul.msk.f32.gmra.mxu0 %vm627_vm2, %v614_v51 }
  0xc4   : > { %926 = vmatmul.f32.gmra.mxu1 %v1752_v11 }
  0xc6   : > { %v1980_v14 = vpop.permute.xlu2 %1306 }
  0xc9   : > { %888 = vmatmul.f32.vlgmr.msrb.gmra.mxu0 %v1795_v32  ;;  %v861_v32 = vadd.f32 %v860_v10, %v835_v8 }
  0xca   : > { %v1047_v6 = vpop.xlane.xlu0 %1046 }
  0xcb   : > { %v1067_v9 = vadd.f32 %v1058_v3, %v1047_v6  ;;  %v1070_v17 = vmul.f32 2.0, %v861_v32 }
  0xcc   : > { %1035 = vmatmul.f32.vlgmr.msrb.gmra.mxu1 %v1772_v23 }
  0xcd   : > { %v1071_v12 = vsub.f32 %v1067_v9, %v1069_v7 }
  0xce   : > { %v1986_v8 = vpop.permute.xlu2 %1245 }
  0xcf   : > { %v1949_v15 = vmax.f32 %v1071_v12, 0.0 }
  0xd1   : > { %896 = vmatmul.f32.gmra.mxu0 %v1774_v24  ;;  %v1113_v20 = vsub.f32 0.0, %v1949_v15 }
  0xd3   : > { %v1116_v22 = vsel %vm1115_vm9, %v1113_v20, -inf }
  0xd4   : > { %1039 = vmatmul.f32.gmra.mxu1 %v1752_v11 }
  0xd9   : > { %1009 = vmatmul.f32.vlgmr.msra.gmra.mxu0 %v1772_v23 }
  0xdb   : > { %v1050_v18 = vpop.xlane.xlu1 %1049 }
  0xdc   : > { %v1068_v19 = vadd.f32 %v1058_v3, %v1050_v18  ;;  %v1992_v18 = vpop.permute.xlu2 %1301 }
  0xdd   : > { %v1960_v45 = vpop.permute.xlu0 %1242 }
  0xde   : > { %v1072_v21 = vsub.f32 %v1068_v19, %v1070_v17 }
  0xe0   : > { %v1952_v24 = vmax.f32 %v1072_v21, 0.0 }
  0xe1   : > { %1013 = vmatmul.f32.gmra.mxu0 %v1752_v11 }
  0xe2   : > { %v1114_v25 = vsub.f32 0.0, %v1952_v24 }
  0xe4   : > { %v1117_v28 = vsel %vm1115_vm9, %v1114_v25, -inf }
  0xe5   : > { %v1118_v23 = vmax.f32 %v1116_v22, %v1117_v28  ;;  %v1968_v53 = vpop.permute.xlu0 %1291 }
  0xe7   : > { %v1119_v29 = vrot.slane %v1118_v23, 4 }
  0xe9   : > { %v1120_v31 = vmax.f32 %v1118_v23, %v1119_v29  ;;  %v2003_v23 = vmax.f32 %v1949_v15, 1e-24 }
  0xeb   : > { %v1121_v33 = vrot.slane %v1120_v31, 2  ;;  %1607 = vrsqrt.f32 %v2003_v23 }
  0xed   : > { %v1122_v34 = vmax.f32 %v1120_v31, %v1121_v33  ;;  %v1974_v16 = vpop.permute.xlu0 %1286  ;;  %v2007_v31 = vpop.permute.xlu2 %1362 }
  0xef   : > { %v1123_v35 = vrot.slane %v1122_v34, 1 }
  0xf1   : > { %v1124_v36 = vmax.f32 %v1122_v34, %v1123_v35  ;;  %v1059_v35 = vmul.f32 %v1922_v30, %v1739_v5 }
  0xf3   : > { %vm1125_vm10 = vcmp.eq.f32.partialorder %v1113_v20, %v1124_v36  ;;  %vm1126_vm11 = vcmp.eq.f32.partialorder %v1114_v25, %v1124_v36  ;;  %v1962_v46 = vpop.permute.xlu1 %1296 }
  0xf4   : > { %v1127_v38 = vsel %vm1125_vm10, -inf, %v1113_v20  ;;  %v1128_v39 = vsel %vm1126_vm11, -inf, %v1114_v25 }
  0xf5   : > { %v1129_v40 = vsel %vm1115_vm9, %v1127_v38, -inf  ;;  %v1130_v11 = vsel %vm1115_vm9, %v1128_v39, -inf  ;;  %v1982_v3 = vpop.permute.xlu0 %1281 }
  0xf6   : > { %v1131_v41 = vmax.f32 %v1129_v40, %v1130_v11 }
  0xf8   : > { %v1132_v42 = vrot.slane %v1131_v41, 4 }
  0xfa   : > { %v1133_v13 = vmax.f32 %v1131_v41, %v1132_v42  ;;  %v1060_v41 = vsel %vm456_vm0, %v1059_v35, 0.0  ;;  %vm1093_vm0 = vweird.f32 %v2003_v23 }
  0xfb   : > { %v1970_v56 = vpop.permute.xlu1 %1236 }
  0xfc   : > { %v1134_v43 = vrot.slane %v1133_v13, 2 }
  0xfd   : > { %v1988_v10 = vpop.permute.xlu0 %1276 }
  0xfe   : > { %v1135_v2 = vmax.f32 %v1133_v13, %v1134_v43  ;;  %v2022_v13 = vmax.f32 %v1952_v24, 1e-24  ;;  %v1608_v43 = vpop.eup %1607 }
  0xff   : > { %vm1094_vm6 = vweird.f32 %v1608_v43 }
 0x100   : > { %v1136_v37 = vrot.slane %v1135_v2, 1  ;;  %1609 = vrsqrt.f32 %v2022_v13  ;;  %vm1095_vm7 = vmor %vm1093_vm0, %vm1094_vm6  ;;  %vm1103_vm8 = vweird.f32 %v2022_v13  ;;  %vm1258_vm0 = vcmp.eq.s32.totalorder %v1986_v8, 1 }
 0x102   : > { %v1137_v44 = vmax.f32 %v1135_v2, %v1136_v37  ;;  %v1061_v2 = vrot.slane %v1060_v41, 4 }
 0x103   : > { %v1976_v62 = vpop.permute.xlu1 %1233 }
 0x104   : > { %vm1138_vm12 = vcmp.eq.f32.partialorder %v1127_v38, %v1137_v44  ;;  %vm1139_vm13 = vcmp.eq.f32.partialorder %v1128_v39, %v1137_v44 }
 0x105   : > { %v1140_v47 = vsel %vm1138_vm12, -inf, %v1127_v38  ;;  %v1141_v48 = vsel %vm1139_vm13, -inf, %v1128_v39  ;;  %v1994_v19 = vpop.permute.xlu0 %1332 }
 0x106   : > { %v1142_v27 = vsel %vm1115_vm9, %v1140_v47, -inf  ;;  %v1143_v49 = vsel %vm1115_vm9, %v1141_v48, -inf }
 0x107   : > { %v1144_v50 = vmax.f32 %v1142_v27, %v1143_v49  ;;  %v1062_v27 = vadd.f32 %v1061_v2, %v1060_v41 }
 0x109   : > { %v1145_v51 = vrot.slane %v1144_v50, 4 }
 0x10b   : > { %v1146_v52 = vmax.f32 %v1144_v50, %v1145_v51  ;;  %v1984_v6 = vpop.permute.xlu1 %1230 }
 0x10d   : > { %v1147_v55 = vrot.slane %v1146_v52, 2  ;;  %v625_v36 = vpop.permute.xlu0 %624 }
 0x10f   : > { %v1148_v57 = vmax.f32 %v1146_v52, %v1147_v55  ;;  %v1610_v52 = vpop.eup %1609 }
 0x110   : > { %vm1104_vm10 = vweird.f32 %v1610_v52 }
 0x111   : > { %v1149_v54 = vrot.slane %v1148_v57, 1  ;;  %vm1105_vm13 = vmor %vm1103_vm8, %vm1104_vm10  ;;  %vm1255_vm8 = vcmp.eq.s32.totalorder %v1970_v56, 1  ;;  %vm1254_vm10 = vcmp.eq.s32.totalorder %v1976_v62, 1 }
 0x113   : > { %v1150_v58 = vmax.f32 %v1148_v57, %v1149_v54  ;;  %v1990_v12 = vpop.permute.xlu1 %1271  ;;  %v1063_v57 = vrot.slane %v1062_v27, 2 }
 0x115   : > { %vm1151_vm14 = vcmp.eq.f32.partialorder %v1140_v47, %v1150_v58  ;;  %vm1152_vm15 = vcmp.eq.f32.partialorder %v1141_v48, %v1150_v58 }
 0x116   : > { %v1153_v60 = vsel %vm1151_vm14, -inf, %v1140_v47  ;;  %v1154_v61 = vsel %vm1152_vm15, -inf, %v1141_v48  ;;  %v2027_v47 = vpop.permute.xlu2 %1357  ;;  %v1088_v48 = vmul.f32 %v1608_v43, %v2003_v23 }
 0x117   : > { %v1155_v63 = vsel %vm1115_vm9, %v1153_v60, -inf  ;;  %v1156_v0 = vsel %vm1115_vm9, %v1154_v61, -inf }
 0x118   : > { %v1157_v1 = vmax.f32 %v1155_v63, %v1156_v0  ;;  %v1089_v50 = vmul.f32 %v1608_v43, %v1088_v48 }
 0x11a   : > { %v1158_v4 = vrot.slane %v1157_v1, 4 }
 0x11b   : > { %v620_v21 = vpop.permute.xlu1 %619 }
 0x11c   : > { %v1159_v7 = vmax.f32 %v1157_v1, %v1158_v4  ;;  %v1064_v1 = vadd.f32 %v1063_v57, %v1062_v27 }
 0x11e   : > { %v1160_v9 = vrot.slane %v1159_v7, 2  ;;  %v2031_v4 = vpop.permute.xlu2 %1239 }
 0x11f   : > { %vm1256_vm6 = vcmp.eq.s32.totalorder %v2031_v4, 1 }
 0x120   : > { %v1161_v32 = vmax.f32 %v1159_v7, %v1160_v9 }
 0x122   : > { %v1162_v17 = vrot.slane %v1161_v32, 1 }
 0x124   : > { %v1163_v20 = vmax.f32 %v1161_v32, %v1162_v17 }
 0x126   : > { %vm1165_vm3 = vcmp.eq.f32.partialorder %v1154_v61, %v1163_v20  ;;  %vm1164_vm4 = vcmp.eq.f32.partialorder %v1153_v60, %v1163_v20 }
 0x127   : > { %v2009_v33 = vsel %vm1165_vm3, -inf, %v1154_v61  ;;  %v2011_v34 = vsel %vm1164_vm4, -inf, %v1153_v60  ;;  %v1090_v60 = vmul.f32 0.5, %v1089_v50  ;;  %v1098_v61 = vmul.f32 %v1610_v52, %v2022_v13 }
 0x128   : > { %v1168_v15 = vsel %vm1115_vm9, %v2011_v34, -inf  ;;  %v1169_v40 = vsel %vm1115_vm9, %v2009_v33, -inf  ;;  %vm1260_vm4 = vcmp.eq.s32.totalorder %v1966_v26, 1 }
 0x129   : > { %v1170_v30 = vmax.f32 %v1168_v15, %v1169_v40  ;;  %v1099_v9 = vmul.f32 %v1610_v52, %v1098_v61  ;;  %v1091_v17 = vsub.f32 1.5, %v1090_v60 }
 0x12b   : > { %v1171_v44 = vrot.slane %v1170_v30, 4 }
 0x12d   : > { %v1172_v49 = vmax.f32 %v1170_v30, %v1171_v44  ;;  %v2034_v30 = vpop.permute.xlu2 %1352 }
 0x12f   : > { %v1173_v58 = vrot.slane %v1172_v49, 2 }
 0x131   : > { %v1174_v7 = vmax.f32 %v1172_v49, %v1173_v58 }
 0x133   : > { %v1175_v35 = vrot.slane %v1174_v7, 1 }
 0x135   : > { %v980_v63 = vpop.f32.mrf.mxu3 }
 0x136   : > { %v651_v22 = vpop.f32.mrf.mxu0 }
 0x137   : > { %v652_v25 = vadd.f32 %v651_v22, %v620_v21  ;;  %v951_v51 = vpop.f32.mrf.mxu2  ;;  %v1065_v22 = vrot.slane %v1064_v1, 1 }
 0x139   : > { %vm657_vm1 = vcmp.ge.f32.partialorder %v652_v25, 0.0  ;;  %v659_v28 = vmul.f32 0.2, %v652_v25  ;;  %v923_v42 = vpop.f32.mrf.mxu1 }
 0x13b   : > { %v661_v29 = vsel %vm657_vm1, %v652_v25, %v659_v28 }
 0x13c   : > { %1446 = vst.msk [vmem:[%s2000_s21] sm:$0xff] %vm1115_vm9, %v661_v29 }
 0x13d   : > { %v986_v41 = vpop.f32.mrf.mxu3 }
 0x13e   : > { %v654_v38 = vpop.f32.mrf.mxu0 }
 0x13f   : > { %v655_v39 = vadd.f32 %v654_v38, %v625_v36  ;;  %v1100_v36 = vmul.f32 0.5, %v1099_v9  ;;  %v1078_v38 = vlaneseq }
 0x140   : > { %v956_v25 = vpop.f32.mrf.mxu2 }
 0x141   : > { %vm658_vm5 = vcmp.ge.f32.partialorder %v655_v39, 0.0  ;;  %v660_v11 = vmul.f32 0.2, %v655_v39  ;;  %v927_v24 = vpop.f32.mrf.mxu1  ;;  %v1079_v2 = vshrl.u32 %v1078_v38, 7  ;;  %v1101_v48 = vsub.f32 1.5, %v1100_v36 }
 0x143   : > { %v662_v5 = vsel %vm658_vm5, %v655_v39, %v660_v11  ;;  %v1092_v39 = vmul.f32 %v1608_v43, %v1091_v17  ;;  %v1066_v11 = vadd.f32 %v1065_v22, %v1064_v1  ;;  %vm1259_vm5 = vcmp.eq.s32.totalorder %v1972_v59, 1 }
 0x144   : > { %1447 = vst.msk [vmem:[%s2000_s21 + $0x8] sm:$0xff] %vm1115_vm9, %v662_v5  ;;  %v1176_v5 = vmax.f32 %v1174_v7, %v1175_v35 }
 0x145   : > { %v1096_v44 = vsel %vm1095_vm7, %v1608_v43, %v1092_v39  ;;  %vm1257_vm7 = vcmp.eq.s32.totalorder %v1960_v45, 1 }
 0x146   : > { %v889_v37 = vpop.f32.mrf.mxu0  ;;  %vm1177_vm11 = vcmp.eq.f32.partialorder %v2011_v34, %v1176_v5  ;;  %vm1178_vm14 = vcmp.eq.f32.partialorder %v2009_v33, %v1176_v5 }
 0x147   : > { %v924_v55 = vadd.f32 %v923_v42, %v889_v37  ;;  %v1082_v37 = vand.u32 127, %v1078_v38  ;;  %v1179_v43 = vsel %vm1177_vm11, -inf, %v2011_v34  ;;  %v1180_v61 = vsel %vm1178_vm14, -inf, %v2009_v33 }
 0x148   : > { %vm1181_vm1 = vcmp.eq.f32.partialorder %v1179_v43, -inf  ;;  %vm1182_vm3 = vcmp.eq.f32.partialorder %v1180_v61, -inf  ;;  %vm1253_vm11 = vcmp.eq.s32.totalorder %v1984_v6, 1 }
 0x149   : > { %v952_v0 = vadd.f32 %v951_v51, %v924_v55  ;;  %v1036_v32 = vpop.f32.mrf.mxu1  ;;  %vm1107_vm12 = vcmp.eq.s32.totalorder %v1079_v2, %v1082_v37  ;;  %v1102_v55 = vmul.f32 %v1610_v52, %v1101_v48 }
 0x14b   : > { %v981_v20 = vadd.f32 %v980_v63, %v952_v0  ;;  %v1106_v60 = vsel %vm1105_vm13, %v1610_v52, %v1102_v55  ;;  %v1348_v63 = vpop.permute.xlu2 %1347 }
 0x14e   : > { %v897_v54 = vpop.f32.mrf.mxu0 }
 0x14f   : > { %v928_v21 = vadd.f32 %v927_v24, %v897_v54  ;;  %v1080_v24 = vadd.s32 8, %v1079_v2 }
 0x151   : > { %v957_v15 = vadd.f32 %v956_v25, %v928_v21  ;;  %v1040_v50 = vpop.f32.mrf.mxu1  ;;  %vm1108_vm15 = vcmp.eq.s32.totalorder %v1080_v24, %v1082_v37 }
 0x153   : > { %v987_v23 = vadd.f32 %v986_v41, %v957_v15  ;;  %v1343_v35 = vpop.permute.xlu2 %1342 }
 0x156   : > { %v1010_v28 = vpop.f32.mrf.mxu0 }
 0x157   : > { %v1011_v29 = vadd.f32 %v1010_v28, %v981_v20 }
 0x159   : > { %v1037_v40 = vadd.f32 %v1036_v32, %v1011_v29 }
 0x15b   : > { %v1075_v42 = vsub.f32 %v1037_v40, %v1066_v11 }
 0x15d   : > { %v1109_v27 = vmul.f32 %v1096_v44, %v1075_v42 }
 0x15e   : > { %v1014_v49 = vpop.f32.mrf.mxu0 }
 0x15f   : > { %v1015_v51 = vadd.f32 %v1014_v49, %v987_v23  ;;  %v1111_v54 = vsel %vm1107_vm12, 0.0, %v1109_v27  ;;  %v1338_v23 = vpop.permute.xlu2 %1337 }
 0x160   : > { %v1183_v0 = vsel %vm1181_vm1, %v1111_v54, -inf  ;;  %v1194_v1 = vsel %vm1181_vm1, %v1111_v54, inf }
 0x161   : > { %v1041_v57 = vadd.f32 %v1040_v50, %v1015_v51  ;;  %v1185_v17 = vsel %vm1115_vm9, %v1183_v0, -inf  ;;  %v1196_v20 = vsel %vm1115_vm9, %v1194_v1, inf }
 0x163   : > { %v1076_v58 = vsub.f32 %v1041_v57, %v1066_v11 }
 0x165   : > { %v1110_v13 = vmul.f32 %v1106_v60, %v1076_v58 }
 0x167   : > { %v1112_v7 = vsel %vm1108_vm15, 0.0, %v1110_v13 }
 0x168   : > { %v1184_v9 = vsel %vm1182_vm3, %v1112_v7, -inf  ;;  %v1195_v32 = vsel %vm1182_vm3, %v1112_v7, inf }
 0x169   : > { %v1186_v34 = vsel %vm1115_vm9, %v1184_v9, -inf  ;;  %v1197_v52 = vsel %vm1115_vm9, %v1195_v32, inf  ;;  %v1398_v9 = vld [vmem:[%s2097_s9 + $0x8] sm:$0xff] }
 0x16a   : > { %v1187_v21 = vmax.f32 %v1185_v17, %v1186_v34  ;;  %v1198_v22 = vmin.f32 %v1196_v20, %v1197_v52 }
 0x16c   : > { %v1188_v33 = vrot.slane %v1187_v21, 4  ;;  %v1199_v25 = vrot.slane %v1198_v22, 4 }
 0x16e   : > { %v1189_v28 = vmax.f32 %v1187_v21, %v1188_v33  ;;  %v1200_v29 = vmin.f32 %v1198_v22, %v1199_v25  ;;  %v1409_v21 = vpop.permute.xlu1 %1408 }
 0x170   : > { %v1190_v36 = vrot.slane %v1189_v28, 2  ;;  %v1201_v38 = vrot.slane %v1200_v29, 2 }
 0x172   : > { %v1191_v39 = vmax.f32 %v1189_v28, %v1190_v36  ;;  %v1202_v15 = vmin.f32 %v1200_v29, %v1201_v38 }
 0x174   : > { %v1192_v40 = vrot.slane %v1191_v39, 1  ;;  %v1203_v11 = vrot.slane %v1202_v15, 1 }
 0x176   : > { %v1193_v41 = vmax.f32 %v1191_v39, %v1192_v40  ;;  %v1204_v42 = vmin.f32 %v1202_v15, %v1203_v11 }
 0x178   : > { %v1268_v5 = vsel %vm1260_vm4, %v1193_v41, %v1204_v42  ;;  %v1267_v2 = vsel %vm1259_vm5, %v1193_v41, %v1204_v42  ;;  %v1266_v37 = vsel %vm1258_vm0, %v1193_v41, %v1204_v42  ;;  %v1265_v26 = vsel %vm1257_vm7, %v1193_v41, %v1204_v42 }
 0x179   : > { %v1316_v59 = vmul.f32 %v1980_v14, %v1268_v5  ;;  %v1315_v8 = vmul.f32 %v1992_v18, %v1267_v2  ;;  %v1314_v44 = vmul.f32 %v1962_v46, %v1266_v37  ;;  %v1313_v48 = vmul.f32 %v1968_v53, %v1265_v26 }
 0x17a   : > { %v1264_v45 = vsel %vm1256_vm6, %v1193_v41, %v1204_v42  ;;  %v1263_v56 = vsel %vm1255_vm8, %v1193_v41, %v1204_v42  ;;  %v1262_v62 = vsel %vm1254_vm10, %v1193_v41, %v1204_v42  ;;  %v1261_v27 = vsel %vm1253_vm11, %v1193_v41, %v1204_v42 }
 0x17b   : > { %v1372_v6 = vadd.f32 %v2007_v31, %v1316_v59  ;;  %v1371_v49 = vadd.f32 %v2027_v47, %v1315_v8  ;;  %v1370_v50 = vadd.f32 %v2034_v30, %v1314_v44  ;;  %v1369_v14 = vadd.f32 %v1348_v63, %v1313_v48 }
 0x17c   : > { %v1312_v18 = vmul.f32 %v1974_v16, %v1264_v45  ;;  %v1311_v53 = vmul.f32 %v1982_v3, %v1263_v56  ;;  %v1310_v57 = vmul.f32 %v1988_v10, %v1262_v62  ;;  %v1309_v30 = vmul.f32 %v1990_v12, %v1261_v27  ;;  %v1328_v3 = vpop.permute.xlu2 %1327 }
 0x17d   : > { %vm1380_vm12 = vcmp.ge.f32.partialorder %v1372_v6, 0.0  ;;  %v1388_v46 = vmul.f32 0.2, %v1372_v6  ;;  %v1387_v51 = vmul.f32 0.2, %v1371_v49  ;;  %vm1379_vm13 = vcmp.ge.f32.partialorder %v1371_v49, 0.0 }
 0x17e   : > { %v1386_v24 = vmul.f32 0.2, %v1370_v50  ;;  %v1368_v55 = vadd.f32 %v1343_v35, %v1312_v18  ;;  %vm1378_vm14 = vcmp.ge.f32.partialorder %v1370_v50, 0.0  ;;  %v1385_v47 = vmul.f32 0.2, %v1369_v14 }
 0x17f   : > { %v1396_v4 = vsel %vm1380_vm12, %v1372_v6, %v1388_v46  ;;  %v1395_v31 = vsel %vm1379_vm13, %v1371_v49, %v1387_v51  ;;  %v1367_v43 = vadd.f32 %v1338_v23, %v1311_v53  ;;  %vm1377_vm15 = vcmp.ge.f32.partialorder %v1369_v14, 0.0 }
 0x180   : > { %1425 = vmatpush.msrb.mxu2 %v1396_v4  ;;  %v1394_v16 = vsel %vm1378_vm14, %v1370_v50, %v1386_v24  ;;  %v1384_v54 = vmul.f32 0.2, %v1368_v55  ;;  %v1366_v58 = vadd.f32 %v1994_v19, %v1310_v57  ;;  %vm1376_vm1 = vcmp.ge.f32.partialorder %v1368_v55, 0.0  ;;  %v1397_v19 = vld [vmem:[%s2097_s9] sm:$0xff] }
 0x181   : > { %v1393_v60 = vsel %vm1377_vm15, %v1369_v14, %v1385_v47  ;;  %v1383_v61 = vmul.f32 0.2, %v1367_v43  ;;  %v1365_v13 = vadd.f32 %v1328_v3, %v1309_v30  ;;  %vm1375_vm3 = vcmp.ge.f32.partialorder %v1367_v43, 0.0 }
 0x182   : > { %1426 = vmatpush.msrb.mxu2 %v1395_v31  ;;  %v1392_v10 = vsel %vm1376_vm1, %v1368_v55, %v1384_v54  ;;  %v1382_v63 = vmul.f32 0.2, %v1366_v58  ;;  %vm1374_vm4 = vcmp.ge.f32.partialorder %v1366_v58, 0.0 }
 0x183   : > { %v1391_v0 = vsel %vm1375_vm3, %v1367_v43, %v1383_v61  ;;  %v1381_v12 = vmul.f32 0.2, %v1365_v13  ;;  %vm1373_vm5 = vcmp.ge.f32.partialorder %v1365_v13, 0.0 }
 0x184   : > { %1427 = vmatpush.msrb.mxu2 %v1394_v16  ;;  %v1390_v1 = vsel %vm1374_vm4, %v1366_v58, %v1382_v63  ;;  %v1404_v32 = vpop.permute.xlu2 %1403 }
 0x185   : > { %v1389_v7 = vsel %vm1373_vm5, %v1365_v13, %v1381_v12 }
 0x186   : > { %1428 = vmatpush.msrb.mxu2 %v1393_v60 }
 0x188   : > { %1429 = vmatpush.msrb.mxu2 %v1392_v10 }
 0x18a   : > { %1430 = vmatpush.msrb.mxu2 %v1391_v0 }
 0x18c   : > { %1431 = vmatpush.msrb.mxu2 %v1390_v1 }
 0x18e   : > { %1432 = vmatpush.msrb.mxu2 %v1389_v7 }
 0x18f   : > { %1567 = vmatmul.msk.f32.vlgmr.msrb.gmra.mxu2 %vm627_vm2, %v1397_v19 }
 0x197   : > { %1568 = vmatmul.msk.f32.gmra.mxu2 %vm627_vm2, %v1398_v9 }
 0x212   : > { %v1434_v17 = vpop.f32.mrf.mxu2 }
 0x213   : > { %v1435_v20 = vadd.f32 %v1434_v17, %v1404_v32 }
 0x215   : > { %vm1440_vm0 = vcmp.ge.f32.partialorder %v1435_v20, 0.0  ;;  %v1442_v34 = vmul.f32 0.2, %v1435_v20 }
 0x217   : > { %v1444_v52 = vsel %vm1440_vm0, %v1435_v20, %v1442_v34 }
 0x218   : > { %1448 = vst.msk [vmem:[%s2000_s21 + $0x10] sm:$0xff] %vm1115_vm9, %v1444_v52 }
 0x21a   : > { %v1437_v22 = vpop.f32.mrf.mxu2 }
 0x21b   : > { %v1438_v33 = vadd.f32 %v1437_v22, %v1409_v21 }
 0x21d   : > { %vm1441_vm6 = vcmp.ge.f32.partialorder %v1438_v33, 0.0  ;;  %v1443_v25 = vmul.f32 0.2, %v1438_v33 }
 0x21f   : > { %v1445_v28 = vsel %vm1441_vm6, %v1438_v33, %v1443_v25 }
 0x220   : > { %1449 = vst.msk [vmem:[%s2000_s21 + $0x18] sm:$0xff] %vm1115_vm9, %v1445_v28 }
 0x221 PF: > { %s21_s19 = sadd.s32 1, %s1633_s19   ;;  %s2100_s17 = smov %s1629_s18 }
 0x222   : > { %p18_p5 = scmp.ge.s32.totalorder %s21_s19, 4   ;;  %s2101_s18 = smov %s2103_s20 }
 0x224   :  { %20 = sbr.rel (!%p18_p5) target bundleno = 2 (0x2), region = 100 }

</bundles_post_ra>
